<compile_context>
chip_gen: v7x
topology: tpu7x:2x2x1
jax: 0.10.0
libtpu: 0.0.40
codegen_flags: <defaults>
</compile_context>

<pallas_src>
import jax
import jax.numpy as jnp
from jax.experimental import pallas as pl
from jax.experimental.pallas import tpu as pltpu

LANE = 128
TILE_BYTES = 2 * 1024 * 1024   # ~2 MiB per tile; 4x (in+out, double-buffered) = 8 MiB
SMALL_BYTES = 512 * 1024       # below this, one full block: launch overhead dominates
MIN_GRID_STEPS = 4             # let ("parallel",) shard across v7x's 2 TensorCores


def _copy_kernel(x_ref, o_ref):
    # Unflatten is a pure reshape: the kernel is a lane-dense identity copy.
    o_ref[...] = x_ref[...]


def _min_sublane(dtype):
    """Minimum row alignment for unmasked stores: sub-32-bit packs along sublanes."""
    itemsize = jnp.dtype(dtype).itemsize
    if itemsize >= 4:
        return 8
    if itemsize == 2:
        return 16
    return 32


def _round_down(x, m):
    return (x // m) * m


def _pick_block_rows(rows, width, dtype):
    itemsize = jnp.dtype(dtype).itemsize
    sublane = _min_sublane(dtype)
    total_bytes = rows * width * itemsize

    # Small arrays: a single full-extent block (always a legal BlockSpec) is
    # cheapest -- the fixed ~0.35us/step overhead would dominate anyway.
    if total_bytes <= SMALL_BYTES or rows <= sublane:
        return rows

    # Largest block that still leaves >= MIN_GRID_STEPS grid steps (v7x megacore).
    max_block = _round_down(max(pl.cdiv(rows, MIN_GRID_STEPS), sublane), sublane)
    # ~2 MiB tile target, rounded to the dtype's sublane multiple.
    target_rows = _round_down(max(TILE_BYTES // (width * itemsize), sublane), sublane)
    return max(sublane, min(target_rows, max_block))


def _tiled_copy_2d(x2d, block_rows):
    rows, width = x2d.shape
    itemsize = jnp.dtype(x2d.dtype).itemsize
    grid = (pl.cdiv(rows, block_rows),)
    return pl.pallas_call(
        _copy_kernel,
        out_shape=jax.ShapeDtypeStruct((rows, width), x2d.dtype),
        grid_spec=pltpu.PrefetchScalarGridSpec(
            num_scalar_prefetch=0,
            grid=grid,
            in_specs=[pl.BlockSpec((block_rows, width), lambda i: (i, 0))],
            out_specs=pl.BlockSpec((block_rows, width), lambda i: (i, 0)),
        ),
        compiler_params=pltpu.CompilerParams(
            dimension_semantics=("parallel",),
        ),
        # Purely memory-bound: 1 read + 1 write of the whole array.
        cost_estimate=pl.CostEstimate(
            flops=0, transcendentals=0,
            bytes_accessed=2 * rows * width * itemsize),
    )(x2d)


def _materialized_unflatten(x, n, C, H, W):
    total = x.size

    # Widest lane-dense width that divides the total element count -> unmasked
    # stores, no pad/slice passes on the common (divisible) path.
    width = None
    for cand in (32 * LANE, 16 * LANE, 8 * LANE, 4 * LANE, 2 * LANE, LANE):
        if total % cand == 0:
            width = cand
            break

    if width is None:
        # Ragged total (not a multiple of 128): rare; pad + tiled copy + slice.
        # TODO(synk): masked tail store instead of pad/slice for large ragged inputs.
        flat = x.reshape(-1)
        padded = pl.cdiv(total, LANE) * LANE
        flat = jnp.pad(flat, (0, padded - total))
        x2d = flat.reshape(padded // LANE, LANE)
        block_rows = _pick_block_rows(x2d.shape[0], LANE, x2d.dtype)
        out2d = _tiled_copy_2d(x2d, block_rows)
        return out2d.reshape(-1)[:total].reshape(n, C, H, W)

    rows = total // width
    x2d = x.reshape(rows, width)  # contiguous row-major -> metadata-only view
    block_rows = _pick_block_rows(rows, width, x2d.dtype)
    out2d = _tiled_copy_2d(x2d, block_rows)
    return out2d.reshape(n, C, H, W)  # free metadata view, like torch .view()


def unflatten(x, *, N=-1, C=128, H=7, W=7, materialize=False):
    """Pallas implementation of Unflatten.forward: (N, C*H*W) -> (N, C, H, W).

    Default path is a metadata-only reshape (identical to torch .view()); set
    materialize=True to force a fresh buffer via the tiled Pallas copy kernel.
    """
    feat = C * H * W
    n = x.shape[0] if N == -1 else N
    assert x.size == n * feat, "input element count must equal N*C*H*W"

    if not materialize:
        # Contiguous row-major reshape is free (no HBM traffic, no launch).
        return x.reshape(n, C, H, W)

    return _materialized_unflatten(x, n, C, H, W)


if __name__ == "__main__":
    key = jax.random.PRNGKey(0)

    # Default module config: C=128, H=7, W=7, batch N=2  ->  x: (2, 6272)
    N_, C_, H_, W_ = 2, 128, 7, 7
    x = jax.random.normal(key, (N_, C_ * H_ * W_), dtype=jnp.float32)

    # Common path: metadata-only reshape (what torch .view() does).
    y_view = jax.block_until_ready(unflatten(x, N=-1, C=C_, H=H_, W=W_))
    assert y_view.shape == (N_, C_, H_, W_), y_view.shape
    assert bool(jnp.all(y_view == x.reshape(N_, C_, H_, W_)))

    # Kernel path: materialized lane-dense copy (small input -> single block).
    y = jax.block_until_ready(
        unflatten(x, N=-1, C=C_, H=H_, W=W_, materialize=True))
    assert y.shape == (N_, C_, H_, W_) and y.dtype == x.dtype
    assert bool(jnp.all(y == x.reshape(N_, C_, H_, W_)))

    # Larger f32 case: exercises the multi-step (>=4 blocks, parallel) grid.
    x2 = jax.random.normal(jax.random.PRNGKey(1), (4, 64 * 32 * 32),
                           dtype=jnp.float32)
    y2 = jax.block_until_ready(unflatten(x2, C=64, H=32, W=32, materialize=True))
    assert y2.shape == (4, 64, 32, 32)
    assert bool(jnp.all(y2 == x2.reshape(4, 64, 32, 32)))

    # bf16 case: dtype-dependent sublane rounding (16-row blocks).
    x3 = jax.random.normal(jax.random.PRNGKey(2),
                           (8, 64 * 32 * 32)).astype(jnp.bfloat16)
    y3 = jax.block_until_ready(unflatten(x3, C=64, H=32, W=32, materialize=True))
    assert y3.shape == (8, 64, 32, 32)
    assert bool(jnp.all(y3 == x3.reshape(8, 64, 32, 32)))

    # Ragged case (total not a multiple of 128): pad + tiled copy + slice.
    x4 = jax.random.normal(jax.random.PRNGKey(3), (2, 3 * 7 * 7),
                           dtype=jnp.float32)
    y4 = jax.block_until_ready(unflatten(x4, C=3, H=7, W=7, materialize=True))
    assert y4.shape == (2, 3, 7, 7)
    assert bool(jnp.all(y4 == x4.reshape(2, 3, 7, 7)))

    print("KERNEL_OK")
</pallas_src>

<mosaic_0001>
module attributes {stable_mosaic.version = 11 : i64} {
  func.func @_copy_kernel(%arg0: i32, %arg1: memref<49x256xf32, #tpu.memory_space<vmem>>, %arg2: memref<49x256xf32, #tpu.memory_space<vmem>>) attributes {dimension_semantics = [#tpu.dimension_semantics<parallel>], iteration_bounds = array<i64: 1>, scalar_prefetch = 0 : i64, scratch_operands = 0 : i64, tpu.core_type = #tpu.core_type<tc>, window_params = [{transform_indices = @transform_0, window_bounds = array<i64: 49, 256>}, {transform_indices = @transform_1, window_bounds = array<i64: 49, 256>}]} {
    %c0 = arith.constant 0 : index
    %c0_0 = arith.constant 0 : index
    %0 = vector.load %arg1[%c0, %c0_0] : memref<49x256xf32, #tpu.memory_space<vmem>>, vector<49x256xf32>
    %c0_1 = arith.constant 0 : index
    %c0_2 = arith.constant 0 : index
    %1 = vector.load %arg2[%c0_1, %c0_2] : memref<49x256xf32, #tpu.memory_space<vmem>>, vector<49x256xf32>
    tpu.vector_store %arg2[%c0_1, %c0_2], %0 {strides = array<i32>} : memref<49x256xf32, #tpu.memory_space<vmem>>, vector<49x256xf32>,
    return
  }
  func.func @transform_0(%arg0: i32) -> (i32, i32) {
    %c0_i32 = arith.constant 0 : i32
    %c0_i32_0 = arith.constant 0 : i32
    return %arg0, %c0_i32 : i32, i32
  }
  func.func @transform_1(%arg0: i32) -> (i32, i32) {
    %c0_i32 = arith.constant 0 : i32
    %c0_i32_0 = arith.constant 0 : i32
    return %arg0, %c0_i32 : i32, i32
  }
}

</mosaic_0001>

<bundles_post_ra>
// kernel: tpu_custom_call.1
= control target key start
LH: loop header
LB: loop body
LE: loop exit
PB: predicated region body
PF: predicated region fallthrough
CT: control target
= control target key end

     0   :  { %6 = vsyncpa [#allocation3], 0  ;;  %s164_s0 = inlined_call_operand.hbm [shape: f32[49,256], index: 0, kind: input, shape index: {}]   ;;  %s165_s1 = inlined_call_operand.hbm [shape: f32[49,256], index: 1, kind: output, shape index: {}]  }
   0x1   :  { %7 = vsyncpa [#allocation4], 0  ;;  %s120_s6 = smov [#allocation2]   ;;  %s72_s10 = scalar_lea.hbm %s164_s0, 1792 }
   0x2   :  { %s13_s7 = sshll.u32 %s120_s6, 4  ;;  %p73_p0 = scmp.ne.s32.totalorder %s164_s0, %s72_s10  ;;  %s14_s7 = int_to_ptr.vmem [resolvable:$true] %s13_s7 }
   0x3   :  { %p76_p1 = scmp.lt.u32.totalorder %s72_s10, %s164_s0 }
   0x5   :  { %p78_p2 = pnand %p76_p1, %p73_p0 }
   0x7   :  { %81 = shalt.err (!%p78_p2)
}
   0x8   :  { %s82_s15 = scalar_lea.vmem %s14_s7, 1792  ;;  %p87_p4 = scmp.lt.s32.totalorder %s14_s7, %s14_s7 }
   0x9   :  { %p83_p3 = scmp.ne.s32.totalorder %s14_s7, %s82_s15  ;;  %p88_p5 = scmp.lt.s32.totalorder %s82_s15, %s82_s15 }
   0xb   :  { %p89_p6 = por %p88_p5, %p87_p4 }
   0xd   :  { %p90_p7 = pnand %p89_p6, %p83_p3 }
   0xf   :  { %93 = shalt.err (!%p90_p7)
}
  0x10   :  { %s121_s16 = smov 256   ;;  %s122_s17 = smov 16  }
  0x11   :  { %19 = dma.hbm_to_vmem [thread:$0]  %s164_s0, 1792, %s14_s7, [#allocation3], %s121_s16, %s121_s16, %s122_s17  }
  0x12   :  { %116 = dma.done.wait [#allocation3], 1792  }
  0x13   :  { %117 = vsyncadd [#allocation3], 4294965504  ;;  %v23_v0 = vld [vmem:[#allocation2] sm:$0xff]  ;;  %v24_v1 = vld [vmem:[#allocation2 + $0x8] sm:$0xff]  ;;  %s123_s20 = smov [#allocation5]  }
  0x14   :  { %v25_v2 = vld [vmem:[#allocation2 + $0x10] sm:$0xff]  ;;  %s56_s21 = sshll.u32 %s123_s20, 4  ;;  %37 = vst [vmem:[#allocation5] sm:$0xff] %v23_v0  ;;  %38 = vst [vmem:[#allocation5 + $0x8] sm:$0xff] %v24_v1  ;;  %v26_v3 = vld [vmem:[#allocation2 + $0x18] sm:$0xff]  ;;  %s57_s21 = int_to_ptr.vmem [resolvable:$true] %s56_s21 }
  0x15   :  { %39 = vst [vmem:[#allocation5 + $0x10] sm:$0xff] %v25_v2  ;;  %v27_v4 = vld [vmem:[#allocation2 + $0x20] sm:$0xff]  ;;  %v28_v5 = vld [vmem:[#allocation2 + $0x28] sm:$0xff]  ;;  %40 = vst [vmem:[#allocation5 + $0x18] sm:$0xff] %v26_v3  ;;  %s94_s0 = scalar_lea.vmem %s57_s21, 1792  ;;  %p99_p9 = scmp.lt.s32.totalorder %s57_s21, %s57_s21 }
  0x16   :  { %41 = vst [vmem:[#allocation5 + $0x20] sm:$0xff] %v27_v4  ;;  %42 = vst [vmem:[#allocation5 + $0x28] sm:$0xff] %v28_v5  ;;  %v29_v6 = vld [vmem:[#allocation2 + $0x30] sm:$0xff]  ;;  %v30_v7 = vld [vmem:[#allocation2 + $0x38] sm:$0xff]  ;;  %p95_p8 = scmp.ne.s32.totalorder %s57_s21, %s94_s0  ;;  %p100_p10 = scmp.lt.s32.totalorder %s94_s0, %s94_s0 }
  0x17   :  { %v31_v8 = vld [vmem:[#allocation2 + $0x40] sm:$0xff]  ;;  %43 = vst [vmem:[#allocation5 + $0x30] sm:$0xff] %v29_v6  ;;  %44 = vst [vmem:[#allocation5 + $0x38] sm:$0xff] %v30_v7  ;;  %v32_v9 = vld [vmem:[#allocation2 + $0x48] sm:$0xff] }
  0x18   :  { %45 = vst [vmem:[#allocation5 + $0x40] sm:$0xff] %v31_v8  ;;  %v33_v10 = vld [vmem:[#allocation2 + $0x50] sm:$0xff]  ;;  %v34_v11 = vld [vmem:[#allocation2 + $0x58] sm:$0xff]  ;;  %46 = vst [vmem:[#allocation5 + $0x48] sm:$0xff] %v32_v9  ;;  %p101_p11 = por %p100_p10, %p99_p9 }
  0x19   :  { %47 = vst [vmem:[#allocation5 + $0x50] sm:$0xff] %v33_v10  ;;  %48 = vst [vmem:[#allocation5 + $0x58] sm:$0xff] %v34_v11  ;;  %v35_v12 = vld [vmem:[#allocation2 + $0x60] sm:$0x1]  ;;  %v36_v13 = vld [vmem:[#allocation2 + $0x68] sm:$0x1] }
  0x1a   :  { %49 = vst [vmem:[#allocation5 + $0x60] sm:$0x1] %v35_v12  ;;  %50 = vst [vmem:[#allocation5 + $0x68] sm:$0x1] %v36_v13  ;;  %p102_p12 = pnand %p101_p11, %p95_p8 }
  0x1c   :  { %105 = shalt.err (!%p102_p12)
}
  0x1d   :  { %s106_s24 = scalar_lea.hbm %s165_s1, 1792 }
  0x1e   :  { %p107_p13 = scmp.ne.s32.totalorder %s165_s1, %s106_s24  ;;  %p110_p0 = scmp.lt.u32.totalorder %s106_s24, %s165_s1 }
  0x20   :  { %p112_p1 = pnand %p110_p0, %p107_p13 }
  0x22   :  { %115 = shalt.err (!%p112_p1)
}
  0x23   :  { %62 = dma.vmem_to_hbm [thread:$0]  %s57_s21, 1792, %s165_s1, [#allocation4], %s121_s16, %s121_s16, %s122_s17  }
  0x24   :  { %118 = dma.done.wait [#allocation4], 1792  }
  0x25   :  { %119 = vsyncadd [#allocation4], 4294965504 }
  0x26   :  { %66 = vsyncpa [#allocation3], 1 }
  0x27   :  { %67 = vsyncpa [#allocation4], 1 }

</bundles_post_ra>
